<compile_context>
chip_gen: v7x
topology: tpu7x:2x2x1
jax: 0.10.0
libtpu: 0.0.40
codegen_flags: <defaults>
</compile_context>

<pallas_src>
import functools

import jax
import jax.numpy as jnp
from jax.experimental import pallas as pl
from jax.experimental.pallas import tpu as pltpu

_LANES = 128
_TARGET_BLOCK_BYTES = 4 * 1024 * 1024  # ~4 MiB per block


def _min_sublanes(itemsize):
    # Min second-to-last tile dim per dtype width: (8,128) 32-bit,
    # (16,128) 16-bit, (32,128) 8-bit.
    return {1: 32, 2: 16, 4: 8}.get(itemsize, 8)


def _simplify_pairs(source_labels, target_labels):
    """Keep only the last target per source; drop pairs whose target is 0.

    Different sources touch disjoint element sets, so order between distinct
    sources is irrelevant; for duplicate sources the last assignment wins
    (matching the reference's sequential overwrites).  A final target of 0 is
    a no-op because the output already defaults to 0.
    """
    last = {}
    for s, t in zip(source_labels, target_labels):
        last[int(s)] = int(t)
    return tuple((s, t) for s, t in last.items() if t != 0)


def _remap(x, pairs):
    out = jnp.zeros_like(x)
    for src, tgt in pairs:
        out = jnp.where(x == jnp.asarray(src, dtype=x.dtype),
                        jnp.asarray(tgt, dtype=out.dtype),
                        out)
    return out


def _convert_labels_kernel(x_ref, o_ref, *, pairs):
    # Unrolled at trace time: L compares + L selects per vreg on the VPU.
    o_ref[...] = _remap(x_ref[...], pairs)


def convert_labels(x, source_labels, target_labels):
    """Pallas-backed forward of ConvertLabels.

    Args:
        x: jnp.ndarray of label indices, shape [batch, *spatial_dims, channels].
        source_labels / target_labels: static Python sequences of label values.

    Returns:
        jnp.ndarray of same shape/dtype with remapped labels (labels not in
        source_labels become 0).
    """
    source_labels = list(source_labels)
    target_labels = list(target_labels)
    assert len(source_labels) == len(target_labels)

    orig_shape = x.shape
    orig_dtype = x.dtype
    pairs = _simplify_pairs(source_labels, target_labels)

    n = 1
    for d in orig_shape:
        n *= d

    if n == 0 or not pairs:
        return jnp.zeros(orig_shape, orig_dtype)

    flat = x.reshape(-1)
    rem = n % _LANES
    main = n - rem

    pieces = []
    if main > 0:
        rows = main // _LANES
        x2d = (flat if rem == 0 else flat[:main]).reshape(rows, _LANES)

        itemsize = jnp.dtype(orig_dtype).itemsize
        min_sub = _min_sublanes(itemsize)
        target_rows = max(min_sub, _TARGET_BLOCK_BYTES // (_LANES * itemsize))
        target_rows = (target_rows // min_sub) * min_sub
        if rows > target_rows:
            # Fixed ~4 MiB tiles; cdiv grid masks the ragged last block.
            tile_rows = target_rows
        else:
            # Whole array in one block (full-extent dim: no divisibility req).
            tile_rows = rows
        grid = (pl.cdiv(rows, tile_rows),)

        kernel = functools.partial(_convert_labels_kernel, pairs=pairs)
        cost = pl.CostEstimate(
            flops=2 * len(pairs) * main,
            bytes_accessed=2 * main * itemsize,
            transcendentals=0,
        )

        out2d = pl.pallas_call(
            kernel,
            out_shape=jax.ShapeDtypeStruct((rows, _LANES), orig_dtype),
            grid=grid,
            in_specs=[pl.BlockSpec((tile_rows, _LANES), lambda i: (i, 0))],
            out_specs=pl.BlockSpec((tile_rows, _LANES), lambda i: (i, 0)),
            compiler_params=pltpu.CompilerParams(
                dimension_semantics=("parallel",),
            ),
            cost_estimate=cost,
        )(x2d)
        pieces.append(out2d.reshape(-1))

    if rem > 0:
        # <=127 trailing elements: remap with plain jnp ops instead of padding
        # and re-slicing the whole array through HBM.
        pieces.append(_remap(flat[main:], pairs))

    out_flat = pieces[0] if len(pieces) == 1 else jnp.concatenate(pieces)
    return out_flat.reshape(orig_shape)


def _reference_convert_labels(x, source_labels, target_labels):
    out = jnp.zeros_like(x)
    for src, tgt in zip(source_labels, target_labels):
        out = jnp.where(x == src, jnp.asarray(tgt, dtype=out.dtype), out)
    return out


if __name__ == "__main__":
    key = jax.random.PRNGKey(0)

    # Channels-last label map: [batch, H, W, channels] = [2, 16, 16, 4].
    # Some values (7, 99) are NOT in source_labels and must map to 0.
    vocab = jnp.asarray([0, 2, 3, 4, 7, 17, 25, 41, 99], dtype=jnp.int32)
    idx = jax.random.randint(key, (2, 16, 16, 4), 0, vocab.shape[0])
    x = vocab[idx]

    source_labels = [0, 2, 3, 4, 17, 25, 41]
    target_labels = [0, 1, 2, 3, 4, 5, 6]

    y = convert_labels(x, source_labels, target_labels)
    y = jax.block_until_ready(y)
    y_ref = _reference_convert_labels(x, source_labels, target_labels)

    assert y.shape == x.shape and y.dtype == x.dtype
    assert bool(jnp.all(y == y_ref))

    # Extra check: non-multiple-of-128 element count (tail path) + uint8 labels.
    x_odd = vocab[jax.random.randint(jax.random.PRNGKey(1), (3, 7, 5, 3), 0,
                                     vocab.shape[0])].astype(jnp.uint8)
    y_odd = jax.block_until_ready(convert_labels(x_odd, source_labels, target_labels))
    y_odd_ref = _reference_convert_labels(x_odd, source_labels, target_labels)
    assert y_odd.dtype == x_odd.dtype and bool(jnp.all(y_odd == y_odd_ref))

    print("KERNEL_OK")
</pallas_src>

<mosaic_0001>
module attributes {stable_mosaic.version = 11 : i64} {
  func.func @_convert_labels_kernel(%arg0: i32, %arg1: memref<16x128xi32, #tpu.memory_space<vmem>>, %arg2: memref<16x128xi32, #tpu.memory_space<vmem>>) attributes {dimension_semantics = [#tpu.dimension_semantics<parallel>], iteration_bounds = array<i64: 1>, scalar_prefetch = 0 : i64, scratch_operands = 0 : i64, tpu.core_type = #tpu.core_type<tc>, window_params = [{transform_indices = @transform_0, window_bounds = array<i64: 16, 128>}, {transform_indices = @transform_1, window_bounds = array<i64: 16, 128>}]} {
    %c0 = arith.constant 0 : index
    %c0_0 = arith.constant 0 : index
    %0 = vector.load %arg1[%c0, %c0_0] : memref<16x128xi32, #tpu.memory_space<vmem>>, vector<16x128xi32>
    %c0_i32 = arith.constant 0 : i32
    %1 = vector.broadcast %c0_i32 : i32 to vector<16x128xi32>
    %c2_i32 = arith.constant 2 : i32
    %2 = vector.broadcast %c2_i32 : i32 to vector<16x128xi32>
    %3 = arith.cmpi eq, %0, %2 : vector<16x128xi32>
    %c1_i32 = arith.constant 1 : i32
    %4 = vector.broadcast %c1_i32 : i32 to vector<16x128xi32>
    %5 = arith.select %3, %4, %1 : vector<16x128xi1>, vector<16x128xi32>
    %c3_i32 = arith.constant 3 : i32
    %6 = vector.broadcast %c3_i32 : i32 to vector<16x128xi32>
    %7 = arith.cmpi eq, %0, %6 : vector<16x128xi32>
    %c2_i32_1 = arith.constant 2 : i32
    %8 = vector.broadcast %c2_i32_1 : i32 to vector<16x128xi32>
    %9 = arith.select %7, %8, %5 : vector<16x128xi1>, vector<16x128xi32>
    %c4_i32 = arith.constant 4 : i32
    %10 = vector.broadcast %c4_i32 : i32 to vector<16x128xi32>
    %11 = arith.cmpi eq, %0, %10 : vector<16x128xi32>
    %c3_i32_2 = arith.constant 3 : i32
    %12 = vector.broadcast %c3_i32_2 : i32 to vector<16x128xi32>
    %13 = arith.select %11, %12, %9 : vector<16x128xi1>, vector<16x128xi32>
    %c17_i32 = arith.constant 17 : i32
    %14 = vector.broadcast %c17_i32 : i32 to vector<16x128xi32>
    %15 = arith.cmpi eq, %0, %14 : vector<16x128xi32>
    %c4_i32_3 = arith.constant 4 : i32
    %16 = vector.broadcast %c4_i32_3 : i32 to vector<16x128xi32>
    %17 = arith.select %15, %16, %13 : vector<16x128xi1>, vector<16x128xi32>
    %c25_i32 = arith.constant 25 : i32
    %18 = vector.broadcast %c25_i32 : i32 to vector<16x128xi32>
    %19 = arith.cmpi eq, %0, %18 : vector<16x128xi32>
    %c5_i32 = arith.constant 5 : i32
    %20 = vector.broadcast %c5_i32 : i32 to vector<16x128xi32>
    %21 = arith.select %19, %20, %17 : vector<16x128xi1>, vector<16x128xi32>
    %c41_i32 = arith.constant 41 : i32
    %22 = vector.broadcast %c41_i32 : i32 to vector<16x128xi32>
    %23 = arith.cmpi eq, %0, %22 : vector<16x128xi32>
    %c6_i32 = arith.constant 6 : i32
    %24 = vector.broadcast %c6_i32 : i32 to vector<16x128xi32>
    %25 = arith.select %23, %24, %21 : vector<16x128xi1>, vector<16x128xi32>
    %c0_4 = arith.constant 0 : index
    %c0_5 = arith.constant 0 : index
    %26 = vector.load %arg2[%c0_4, %c0_5] : memref<16x128xi32, #tpu.memory_space<vmem>>, vector<16x128xi32>
    tpu.vector_store %arg2[%c0_4, %c0_5], %25 {strides = array<i32>} : memref<16x128xi32, #tpu.memory_space<vmem>>, vector<16x128xi32>,
    return
  }
  func.func @transform_0(%arg0: i32) -> (i32, i32) {
    %c0_i32 = arith.constant 0 : i32
    %c0_i32_0 = arith.constant 0 : i32
    return %arg0, %c0_i32 : i32, i32
  }
  func.func @transform_1(%arg0: i32) -> (i32, i32) {
    %c0_i32 = arith.constant 0 : i32
    %c0_i32_0 = arith.constant 0 : i32
    return %arg0, %c0_i32 : i32, i32
  }
}

</mosaic_0001>

<bundles_post_ra>
// kernel: tpu_custom_call.1
= control target key start
LH: loop header
LB: loop body
LE: loop exit
PB: predicated region body
PF: predicated region fallthrough
CT: control target
= control target key end

     0   :  { %6 = vsyncpa [#allocation3], 0  ;;  %s169_s0 = inlined_call_operand.hbm [shape: s32[16,128], index: 0, kind: input, shape index: {}]   ;;  %s170_s1 = inlined_call_operand.hbm [shape: s32[16,128], index: 1, kind: output, shape index: {}]  }
   0x1   :  { %7 = vsyncpa [#allocation4], 0  ;;  %s121_s6 = smov [#allocation2]   ;;  %s73_s10 = scalar_lea.hbm %s169_s0, 256 }
   0x2   :  { %s13_s7 = sshll.u32 %s121_s6, 4  ;;  %p74_p0 = scmp.ne.s32.totalorder %s169_s0, %s73_s10  ;;  %s14_s7 = int_to_ptr.vmem [resolvable:$true] %s13_s7 }
   0x3   :  { %p77_p1 = scmp.lt.u32.totalorder %s73_s10, %s169_s0 }
   0x5   :  { %p79_p2 = pnand %p77_p1, %p74_p0 }
   0x7   :  { %82 = shalt.err (!%p79_p2)
}
   0x8   :  { %s83_s15 = scalar_lea.vmem %s14_s7, 256  ;;  %p88_p4 = scmp.lt.s32.totalorder %s14_s7, %s14_s7 }
   0x9   :  { %p84_p3 = scmp.ne.s32.totalorder %s14_s7, %s83_s15  ;;  %p89_p5 = scmp.lt.s32.totalorder %s83_s15, %s83_s15 }
   0xb   :  { %p90_p6 = por %p89_p5, %p88_p4 }
   0xd   :  { %p91_p7 = pnand %p90_p6, %p84_p3 }
   0xf   :  { %94 = shalt.err (!%p91_p7)
}
  0x10   :  { %s122_s16 = smov 128   ;;  %s123_s17 = smov 8  }
  0x11   :  { %19 = dma.hbm_to_vmem [thread:$0]  %s169_s0, 256, %s14_s7, [#allocation3], %s122_s16, %s122_s16, %s123_s17  }
  0x12   :  { %117 = dma.done.wait [#allocation3], 256  }
  0x13   :  { %118 = vsyncadd [#allocation3], 4294967040  ;;  %v23_v0 = vld [vmem:[#allocation2] sm:$0xff]  ;;  %v24_v1 = vld [vmem:[#allocation2 + $0x8] sm:$0xff]  ;;  %v124_v2 = vmov 0   ;;  %s125_s0 = smov [#allocation5]  }
  0x14   :  { %vm25_vm0 = vcmp.eq.s32.totalorder %v23_v0, 2  ;;  %vm29_vm1 = vcmp.eq.s32.totalorder %v23_v0, 3  ;;  %vm33_vm2 = vcmp.eq.s32.totalorder %v23_v0, 4  ;;  %vm37_vm3 = vcmp.eq.s32.totalorder %v23_v0, 17  ;;  %s56_s20 = sshll.u32 %s125_s0, 4  ;;  %s57_s20 = int_to_ptr.vmem [resolvable:$true] %s56_s20 }
  0x15   :  { %v27_v3 = vsel %vm25_vm0, 1, %v124_v2  ;;  %vm41_vm4 = vcmp.eq.s32.totalorder %v23_v0, 25  ;;  %vm45_vm5 = vcmp.eq.s32.totalorder %v23_v0, 41  ;;  %vm26_vm6 = vcmp.eq.s32.totalorder %v24_v1, 2  ;;  %s95_s21 = scalar_lea.vmem %s57_s20, 256  ;;  %p100_p9 = scmp.lt.s32.totalorder %s57_s20, %s57_s20 }
  0x16   :  { %v31_v4 = vsel %vm29_vm1, 2, %v27_v3  ;;  %v28_v5 = vsel %vm26_vm6, 1, %v124_v2  ;;  %vm30_vm7 = vcmp.eq.s32.totalorder %v24_v1, 3  ;;  %vm34_vm8 = vcmp.eq.s32.totalorder %v24_v1, 4  ;;  %p96_p8 = scmp.ne.s32.totalorder %s57_s20, %s95_s21  ;;  %p101_p10 = scmp.lt.s32.totalorder %s95_s21, %s95_s21 }
  0x17   :  { %v35_v6 = vsel %vm33_vm2, 3, %v31_v4  ;;  %v32_v7 = vsel %vm30_vm7, 2, %v28_v5  ;;  %vm38_vm9 = vcmp.eq.s32.totalorder %v24_v1, 17  ;;  %vm42_vm10 = vcmp.eq.s32.totalorder %v24_v1, 25 }
  0x18   :  { %v39_v8 = vsel %vm37_vm3, 4, %v35_v6  ;;  %v36_v9 = vsel %vm34_vm8, 3, %v32_v7  ;;  %vm46_vm11 = vcmp.eq.s32.totalorder %v24_v1, 41  ;;  %p102_p11 = por %p101_p10, %p100_p9 }
  0x19   :  { %v43_v10 = vsel %vm41_vm4, 5, %v39_v8  ;;  %v40_v11 = vsel %vm38_vm9, 4, %v36_v9 }
  0x1a   :  { %v47_v12 = vsel %vm45_vm5, 6, %v43_v10  ;;  %v44_v13 = vsel %vm42_vm10, 5, %v40_v11  ;;  %p103_p12 = pnand %p102_p11, %p96_p8 }
  0x1b   :  { %49 = vst [vmem:[#allocation5] sm:$0xff] %v47_v12  ;;  %v48_v14 = vsel %vm46_vm11, 6, %v44_v13 }
  0x1c   :  { %50 = vst [vmem:[#allocation5 + $0x8] sm:$0xff] %v48_v14 }
  0x1d   :  { %106 = shalt.err (!%p103_p12)
}
  0x1e   :  { %s107_s24 = scalar_lea.hbm %s170_s1, 256 }
  0x1f   :  { %p108_p13 = scmp.ne.s32.totalorder %s170_s1, %s107_s24  ;;  %p111_p0 = scmp.lt.u32.totalorder %s107_s24, %s170_s1 }
  0x21   :  { %p113_p1 = pnand %p111_p0, %p108_p13 }
  0x23   :  { %116 = shalt.err (!%p113_p1)
}
  0x24   :  { %62 = dma.vmem_to_hbm [thread:$0]  %s57_s20, 256, %s170_s1, [#allocation4], %s122_s16, %s122_s16, %s123_s17  }
  0x25   :  { %119 = dma.done.wait [#allocation4], 256  }
  0x26   :  { %120 = vsyncadd [#allocation4], 4294967040 }
  0x27   :  { %66 = vsyncpa [#allocation3], 1 }
  0x28   :  { %67 = vsyncpa [#allocation4], 1 }

</bundles_post_ra>
